<compile_context>
chip_gen: v5e
topology: v5e:2x2
jax: 0.10.0
libtpu: 0.0.40
codegen_flags: <defaults>
</compile_context>

<pallas_src>
import functools

import jax
import jax.numpy as jnp
from jax.experimental import pallas as pl
from jax.experimental.pallas import tpu as pltpu


D_MODEL = 512          # chronos-bolt-small default
LAYER_NORM_EPS = 1e-6  # chronos-bolt-small default


def _rmsnorm_kernel(x_ref, w_ref, o_ref, *, eps, inv_d):
    # x_ref: (block_rows, d_pad); w_ref: (1, d_pad), already float32.
    # Pass 1 (reduction): sum of squares in f32. Padded lanes (if any) are
    # zero, so they do not perturb the sum; divide by the TRUE d_model.
    xf = x_ref[...].astype(jnp.float32)
    ss = jnp.sum(xf * xf, axis=-1, keepdims=True)
    inv = jax.lax.rsqrt(ss * inv_d + eps)   # EUP rsqrt: hidden under DMA
    # Pass 2 (scale/store): re-read x_ref in its native dtype so a full f32
    # copy of the block need not stay live across the reduction for
    # sub-32-bit inputs (for f32 the second read is trivially CSE'd).
    y = x_ref[...].astype(jnp.float32) * inv
    o_ref[...] = (w_ref[...] * y).astype(o_ref.dtype)


def _round_up(x, m):
    return ((x + m - 1) // m) * m


def _vmem_capacity_bytes():
    # Generation-aware VMEM sizing; conservative (v7x per-TC) fallback.
    try:
        return int(pltpu.get_tpu_info().vmem_capacity_bytes)
    except Exception:
        return 64 * 1024 * 1024


def rmsnorm(hidden_states, weight, eps=LAYER_NORM_EPS, block_rows=None):
    """hidden_states: (..., d_model); weight: (d_model,)."""
    orig_shape = hidden_states.shape
    d_model = orig_shape[-1]
    x2d = hidden_states.reshape(-1, d_model)
    rows = x2d.shape[0]

    itemsize = jnp.dtype(hidden_states.dtype).itemsize
    # Sublane packing: f32 -> 8 rows/vreg, bf16 -> 16, int8/fp8 -> 32.
    row_align = 8 * max(1, 4 // itemsize) if itemsize <= 4 else 8

    # Default block: ~4-8 MiB tiles (2048 rows f32 / 4096 rows bf16) so the
    # ~0.35 us per-grid-step overhead is negligible even at v7x's 3.2 TB/s.
    if block_rows is None:
        block_rows = 2048 if itemsize >= 4 else 4096

    # Lane-density guard: keep last dim a multiple of 128 so stores are
    # unmasked vst (d_model=512 is already fine; this protects other configs).
    d_pad = _round_up(d_model, 128)
    if d_pad != d_model:
        x2d = jnp.pad(x2d, ((0, 0), (0, d_pad - d_model)))
    w2d = weight.reshape(1, d_model).astype(jnp.float32)
    if d_pad != d_model:
        w2d = jnp.pad(w2d, ((0, 0), (0, d_pad - d_model)))

    # Requested block, aligned to the sublane packing.
    eff_block = max(row_align, (block_rows // row_align) * row_align)
    # Never bigger than needed to cover all rows (keeps small inputs tiny).
    eff_block = min(eff_block, _round_up(rows, row_align))

    # Cap the block so double-buffered in+out tiles (plus one f32 temp for
    # sub-32-bit inputs) fit in a generation-aware VMEM budget.
    vmem_phys = _vmem_capacity_bytes()
    budget_bytes = int(0.45 * vmem_phys)
    f32_temp = 0 if itemsize >= 4 else 4   # f32 input: no upcast copy lives
    per_row_bytes = d_pad * (4 * itemsize + f32_temp)  # 2x(in+out) bufs + temp
    max_rows_for_budget = max(
        row_align, (budget_bytes // per_row_bytes) // row_align * row_align)
    eff_block = min(eff_block, max_rows_for_budget)

    grid = (pl.cdiv(rows, eff_block),)

    tile_bytes = eff_block * d_pad * itemsize
    needed = 2 * 2 * tile_bytes + eff_block * d_pad * f32_temp + (2 << 20)
    # Never request the full physical VMEM (leave headroom for Mosaic scratch).
    vmem_limit = int(min(max(needed, 32 * 1024 * 1024), int(0.75 * vmem_phys)))

    cost = pl.CostEstimate(
        flops=3 * rows * d_model,
        transcendentals=rows,
        bytes_accessed=2 * rows * d_model * itemsize + d_model * 4,
    )

    out = pl.pallas_call(
        functools.partial(_rmsnorm_kernel, eps=eps, inv_d=1.0 / d_model),
        out_shape=jax.ShapeDtypeStruct((rows, d_pad), hidden_states.dtype),
        grid_spec=pltpu.PrefetchScalarGridSpec(
            num_scalar_prefetch=0,
            grid=grid,
            in_specs=[
                pl.BlockSpec((eff_block, d_pad), lambda i: (i, 0)),
                pl.BlockSpec((1, d_pad), lambda i: (0, 0)),
            ],
            out_specs=pl.BlockSpec((eff_block, d_pad), lambda i: (i, 0)),
        ),
        compiler_params=pltpu.CompilerParams(
            # Row grid is embarrassingly parallel: lets Mosaic shard it across
            # both TensorCores on v7x.  (If xprof ever shows a single TC
            # streaming, switch to pltpu.CORE_PARALLEL.)
            dimension_semantics=(pltpu.PARALLEL,),
            vmem_limit_bytes=vmem_limit,
        ),
        cost_estimate=cost,
    )(x2d, w2d)

    if d_pad != d_model:
        out = out[:, :d_model]
    return out.reshape(orig_shape)


def rmsnorm_reference(hidden_states, weight, eps=LAYER_NORM_EPS):
    x = hidden_states.astype(jnp.float32)
    variance = jnp.mean(x * x, axis=-1, keepdims=True)
    x = x * jax.lax.rsqrt(variance + eps)
    return (weight.astype(jnp.float32) * x).astype(hidden_states.dtype)


if __name__ == "__main__":
    key = jax.random.PRNGKey(0)
    k1, k2, k3, k4, k5 = jax.random.split(key, 5)

    # Case 1: module-default init (weight = ones), small batch/seq, d_model=512.
    batch, seq, d_model = 2, 8, D_MODEL
    x = jax.random.normal(k1, (batch, seq, d_model), dtype=jnp.float32)
    weight = jnp.ones((d_model,), dtype=jnp.float32)
    out = jax.block_until_ready(rmsnorm(x, weight))
    ref = rmsnorm_reference(x, weight)
    assert out.shape == x.shape and out.dtype == x.dtype
    assert jnp.allclose(out, ref, atol=1e-5, rtol=1e-5), "mismatch (case 1)"

    # Case 2: rows not a multiple of the sublane alignment (masked partial
    # last block), non-trivial weight.
    x2 = jax.random.normal(k2, (3, 5, d_model), dtype=jnp.float32)
    w2 = 1.0 + 0.1 * jax.random.normal(k3, (d_model,), dtype=jnp.float32)
    out2 = jax.block_until_ready(rmsnorm(x2, w2))
    ref2 = rmsnorm_reference(x2, w2)
    assert jnp.allclose(out2, ref2, atol=1e-5, rtol=1e-5), "mismatch (case 2)"

    # Case 3: bf16 input (sub-32-bit path: row_align=16, f32 temp accounting).
    x3 = jax.random.normal(k4, (2, 8, d_model), dtype=jnp.float32).astype(jnp.bfloat16)
    out3 = jax.block_until_ready(rmsnorm(x3, w2))
    ref3 = rmsnorm_reference(x3, w2)
    assert out3.dtype == jnp.bfloat16
    assert jnp.allclose(out3.astype(jnp.float32), ref3.astype(jnp.float32),
                        atol=2e-2, rtol=2e-2), "mismatch (case 3)"

    # Case 4: d_model not a multiple of 128 (exercises the lane-padding path).
    d_odd = 320
    x4 = jax.random.normal(k5, (4, 7, d_odd), dtype=jnp.float32)
    w4 = 1.0 + 0.1 * jax.random.normal(k3, (d_odd,), dtype=jnp.float32)
    out4 = jax.block_until_ready(rmsnorm(x4, w4))
    ref4 = rmsnorm_reference(x4, w4)
    assert jnp.allclose(out4, ref4, atol=1e-5, rtol=1e-5), "mismatch (case 4)"

    print("KERNEL_OK")
</pallas_src>

<mosaic_0001>
module attributes {stable_mosaic.version = 11 : i64} {
  func.func @_rmsnorm_kernel(%arg0: i32, %arg1: memref<16x512xf32, #tpu.memory_space<vmem>>, %arg2: memref<1x512xf32, #tpu.memory_space<vmem>>, %arg3: memref<16x512xf32, #tpu.memory_space<vmem>>) attributes {dimension_semantics = [#tpu.dimension_semantics<parallel>], iteration_bounds = array<i64: 1>, scalar_prefetch = 0 : i64, scratch_operands = 0 : i64, tpu.core_type = #tpu.core_type<tc>, window_params = [{transform_indices = @transform_0, window_bounds = array<i64: 16, 512>}, {pipeline_mode = #tpu.pipeline_mode<synchronous>, transform_indices = @transform_1, window_bounds = array<i64: 1, 512>}, {transform_indices = @transform_2, window_bounds = array<i64: 16, 512>}]} {
    %c0 = arith.constant 0 : index
    %c0_0 = arith.constant 0 : index
    %0 = vector.load %arg1[%c0, %c0_0] : memref<16x512xf32, #tpu.memory_space<vmem>>, vector<16x512xf32>
    %1 = arith.mulf %0, %0 : vector<16x512xf32>
    %cst = arith.constant dense<0.000000e+00> : vector<16xf32>
    %2 = vector.multi_reduction <add>, %1, %cst [1] : vector<16x512xf32> to vector<16xf32>
    %3 = vector.shape_cast %2 : vector<16xf32> to vector<16x1xf32>
    %cst_1 = arith.constant 0.001953125 : f32
    %4 = vector.broadcast %cst_1 : f32 to vector<16x1xf32>
    %5 = arith.mulf %3, %4 : vector<16x1xf32>
    %cst_2 = arith.constant 9.99999997E-7 : f32
    %6 = vector.broadcast %cst_2 : f32 to vector<16x1xf32>
    %7 = arith.addf %5, %6 : vector<16x1xf32>
    %8 = math.rsqrt %7 : vector<16x1xf32>
    %c0_3 = arith.constant 0 : index
    %c0_4 = arith.constant 0 : index
    %9 = vector.load %arg1[%c0_3, %c0_4] : memref<16x512xf32, #tpu.memory_space<vmem>>, vector<16x512xf32>
    %10 = vector.broadcast %8 : vector<16x1xf32> to vector<16x512xf32>
    %11 = arith.mulf %9, %10 : vector<16x512xf32>
    %c0_5 = arith.constant 0 : index
    %c0_6 = arith.constant 0 : index
    %12 = vector.load %arg2[%c0_5, %c0_6] : memref<1x512xf32, #tpu.memory_space<vmem>>, vector<1x512xf32>
    %13 = vector.broadcast %12 : vector<1x512xf32> to vector<16x512xf32>
    %14 = arith.mulf %13, %11 : vector<16x512xf32>
    %c0_7 = arith.constant 0 : index
    %c0_8 = arith.constant 0 : index
    %15 = vector.load %arg3[%c0_7, %c0_8] : memref<16x512xf32, #tpu.memory_space<vmem>>, vector<16x512xf32>
    tpu.vector_store %arg3[%c0_7, %c0_8], %14 {strides = array<i32>} : memref<16x512xf32, #tpu.memory_space<vmem>>, vector<16x512xf32>,
    return
  }
  func.func @transform_0(%arg0: i32) -> (i32, i32) {
    %c0_i32 = arith.constant 0 : i32
    %c0_i32_0 = arith.constant 0 : i32
    return %arg0, %c0_i32 : i32, i32
  }
  func.func @transform_1(%arg0: i32) -> (i32, i32) {
    %c0_i32 = arith.constant 0 : i32
    %c0_i32_0 = arith.constant 0 : i32
    %c0_i32_1 = arith.constant 0 : i32
    return %c0_i32, %c0_i32_0 : i32, i32
  }
  func.func @transform_2(%arg0: i32) -> (i32, i32) {
    %c0_i32 = arith.constant 0 : i32
    %c0_i32_0 = arith.constant 0 : i32
    return %arg0, %c0_i32 : i32, i32
  }
}

</mosaic_0001>

<bundles_post_ra>
// kernel: tpu_custom_call.1
= control target key start
LH: loop header
LB: loop body
LE: loop exit
PB: predicated region body
PF: predicated region fallthrough
CT: control target
= control target key end

     0   :  { %7 = vsyncpa [#allocation3], 0  ;;  %s273_s0 = inlined_call_operand.hbm [shape: f32[16,512], index: 0, kind: input, shape index: {}]   ;;  %s274_s1 = inlined_call_operand.hbm [shape: f32[1,512], index: 1, kind: input, shape index: {}]   ;;  %s275_s2 = inlined_call_operand.hbm [shape: f32[16,512], index: 2, kind: output, shape index: {}]  }
   0x1   :  { %8 = vsyncpa [#allocation6], 0 }
   0x2   :  { %9 = vsyncpa [#allocation4], 0  ;;  %s14_s11 = sshll.u32 %s273_s0, 4  ;;  %s233_s12 = smov [#allocation2]   ;;  %s15_s11 = int_to_ptr.hbm [resolvable:$true] %s14_s11 }
   0x3   :  { %s16_s13 = sshll.u32 %s233_s12, 4  ;;  %s28_s16 = sshll.u32 %s274_s1, 4  ;;  %s17_s13 = int_to_ptr.vmem [resolvable:$true] %s16_s13  ;;  %s29_s16 = int_to_ptr.hbm [resolvable:$true] %s28_s16 }
   0x4   :  { %s234_s17 = smov 512   ;;  %s235_s18 = smov 32  }
   0x5   :  { %22 = dma.hbm_to_vmem [thread:$0]  %s15_s11, 1024, %s17_s13, [#allocation3], %s234_s17, %s234_s17, %s235_s18  }
   0x6   :  { %s236_s19 = smov [#allocation5]  }
   0x7   :  { %s30_s20 = sshll.u32 %s236_s19, 4  ;;  %s31_s20 = int_to_ptr.vmem [resolvable:$true] %s30_s20 }
   0x8   :  { %33 = dma.hbm_to_vmem [thread:$0]  %s29_s16, 64, %s31_s20, [#allocation6]  }
   0x9   :  { %227 = dma.done.wait [#allocation3], 1024  }
   0xa   :  { %228 = vsyncadd [#allocation3], 4294966272 }
   0xb   :  { %229 = dma.done.wait [#allocation6], 64  }
   0xc   :  { %230 = vsyncadd [#allocation6], 4294967232  ;;  %v42_v0 = vld [vmem:[#allocation2] sm:$0xff]  ;;  %v43_v1 = vld [vmem:[#allocation2 + $0x8] sm:$0xff]  ;;  %s237_s0 = smov [#allocation7]   ;;  %s132_s23 = sshll.u32 %s275_s2, 4  ;;  %s133_s23 = int_to_ptr.hbm [resolvable:$true] %s132_s23 }
   0xd   :  { %v44_v2 = vld [vmem:[#allocation2 + $0x10] sm:$0xff]  ;;  %v45_v3 = vld [vmem:[#allocation2 + $0x18] sm:$0xff]  ;;  %v50_v4 = vmul.f32 %v42_v0, %v42_v0  ;;  %v51_v5 = vmul.f32 %v43_v1, %v43_v1  ;;  %v262_v7 = vld [vmem:[#allocation2 + $0x20] sm:$0xff]  ;;  %s130_s1 = sshll.u32 %s237_s0, 4  ;;  %s131_s1 = int_to_ptr.vmem [resolvable:$true] %s130_s1 }
   0xe   :  { %v52_v6 = vmul.f32 %v44_v2, %v44_v2  ;;  %v47_v8 = vld [vmem:[#allocation2 + $0x28] sm:$0xff]  ;;  %v48_v9 = vld [vmem:[#allocation2 + $0x30] sm:$0xff]  ;;  %v54_v10 = vmul.f32 %v262_v7, %v262_v7  ;;  %v53_v12 = vmul.f32 %v45_v3, %v45_v3  ;;  %v49_v17 = vld [vmem:[#allocation2 + $0x38] sm:$0xff] }
   0xf   :  { %v55_v11 = vmul.f32 %v47_v8, %v47_v8  ;;  %v58_v13 = vadd.f32 %v51_v5, %v50_v4  ;;  %v56_v15 = vmul.f32 %v48_v9, %v48_v9  ;;  %v57_v19 = vmul.f32 %v49_v17, %v49_v17  ;;  %v100_v32 = vld [vmem:[#allocation5] sm:$0xf] }
  0x10   :  { %v102_v37 = vperm.slane %v100_v32, 0  ;;  %v103_v38 = vperm.slane %v100_v32, 1  ;;  %v104_v39 = vperm.slane %v100_v32, 2  ;;  %v105_v40 = vperm.slane %v100_v32, 3 }
  0x11   :  { %v59_v14 = vadd.f32 %v58_v13, %v52_v6  ;;  %v63_v16 = vadd.f32 %v55_v11, %v54_v10 }
  0x13   :  { %v60_v18 = vadd.f32 %v59_v14, %v53_v12  ;;  %v64_v20 = vadd.f32 %v63_v16, %v56_v15 }
  0x15   :  { %61 = vadd.xlane.f32.xlu0 %v60_v18  ;;  %v65_v21 = vadd.f32 %v64_v20, %v57_v19 }
  0x1d   :  { %66 = vadd.xlane.f32.xlu0 %v65_v21 }
  0x88   :  { %v62_v22 = vpop.xlane.xlu0 %61 }
  0x89   :  { %v68_v23 = vmul.f32 0.001953125, %v62_v22 }
  0x8b   :  { %v70_v24 = vadd.f32 1e-06, %v68_v23 }
  0x8d   :  { %151 = vrsqrt.f32 %v70_v24  ;;  %vm78_vm1 = vweird.f32 %v70_v24 }
  0x90   :  { %v67_v25 = vpop.xlane.xlu0 %66 }
  0x91   :  { %v69_v26 = vmul.f32 0.001953125, %v67_v25 }
  0x93   :  { %v152_v27 = vpop.eup %151  ;;  %v71_v28 = vadd.f32 1e-06, %v69_v26 }
  0x94   :  { %v73_v29 = vmul.f32 %v152_v27, %v70_v24  ;;  %vm79_vm0 = vweird.f32 %v152_v27 }
  0x95   :  { %153 = vrsqrt.f32 %v71_v28  ;;  %vm80_vm2 = vmor %vm78_vm1, %vm79_vm0  ;;  %vm88_vm4 = vweird.f32 %v71_v28 }
  0x96   :  { %v74_v30 = vmul.f32 %v152_v27, %v73_v29 }
  0x98   :  { %v75_v31 = vmul.f32 0.5, %v74_v30 }
  0x9a   :  { %v76_v33 = vsub.f32 1.5, %v75_v31 }
  0x9b   :  { %v154_v34 = vpop.eup %153 }
  0x9c   :  { %v77_v35 = vmul.f32 %v152_v27, %v76_v33  ;;  %v83_v36 = vmul.f32 %v154_v34, %v71_v28  ;;  %vm89_vm3 = vweird.f32 %v154_v34 }
  0x9d   :  { %vm90_vm5 = vmor %vm88_vm4, %vm89_vm3 }
  0x9e   :  { %v81_v41 = vsel %vm80_vm2, %v152_v27, %v77_v35  ;;  %v84_v42 = vmul.f32 %v154_v34, %v83_v36 }
  0x9f   :  { %v92_v43 = vmul.f32 %v81_v41, %v42_v0  ;;  %v93_v44 = vmul.f32 %v81_v41, %v43_v1  ;;  %v94_v45 = vmul.f32 %v81_v41, %v44_v2  ;;  %v95_v46 = vmul.f32 %v81_v41, %v45_v3 }
  0xa0   :  { %v85_v47 = vmul.f32 0.5, %v84_v42 }
  0xa1   :  { %v110_v48 = vmul.f32 %v102_v37, %v92_v43  ;;  %v111_v49 = vmul.f32 %v103_v38, %v93_v44  ;;  %v112_v50 = vmul.f32 %v104_v39, %v94_v45  ;;  %v113_v51 = vmul.f32 %v105_v40, %v95_v46 }
  0xa2   :  { %v86_v52 = vsub.f32 1.5, %v85_v47 }
  0xa3   :  { %118 = vst [vmem:[#allocation7] sm:$0xff] %v110_v48 }
  0xa4   :  { %119 = vst [vmem:[#allocation7 + $0x8] sm:$0xff] %v111_v49  ;;  %v87_v53 = vmul.f32 %v154_v34, %v86_v52 }
  0xa5   :  { %120 = vst [vmem:[#allocation7 + $0x10] sm:$0xff] %v112_v50 }
  0xa6   :  { %121 = vst [vmem:[#allocation7 + $0x18] sm:$0xff] %v113_v51  ;;  %v91_v54 = vsel %vm90_vm5, %v154_v34, %v87_v53 }
  0xa7   :  { %v96_v55 = vmul.f32 %v91_v54, %v262_v7  ;;  %v97_v56 = vmul.f32 %v91_v54, %v47_v8  ;;  %v98_v57 = vmul.f32 %v91_v54, %v48_v9  ;;  %v99_v58 = vmul.f32 %v91_v54, %v49_v17 }
  0xa9   :  { %v114_v59 = vmul.f32 %v102_v37, %v96_v55  ;;  %v115_v60 = vmul.f32 %v103_v38, %v97_v56  ;;  %v116_v61 = vmul.f32 %v104_v39, %v98_v57  ;;  %v117_v62 = vmul.f32 %v105_v40, %v99_v58 }
  0xab   :  { %122 = vst [vmem:[#allocation7 + $0x20] sm:$0xff] %v114_v59 }
  0xac   :  { %123 = vst [vmem:[#allocation7 + $0x28] sm:$0xff] %v115_v60 }
  0xad   :  { %124 = vst [vmem:[#allocation7 + $0x30] sm:$0xff] %v116_v61 }
  0xae   :  { %125 = vst [vmem:[#allocation7 + $0x38] sm:$0xff] %v117_v62 }
  0xaf   :  { %138 = dma.vmem_to_hbm [thread:$0]  %s131_s1, 1024, %s133_s23, [#allocation4], %s234_s17, %s234_s17, %s235_s18  }
  0xb0   :  { %231 = dma.done.wait [#allocation4], 1024  }
  0xb1   :  { %232 = vsyncadd [#allocation4], 4294966272 }
  0xb2   :  { %143 = vsyncpa [#allocation3], 1 }
  0xb3   :  { %144 = vsyncpa [#allocation6], 1 }
  0xb4   :  { %145 = vsyncpa [#allocation4], 1 }

</bundles_post_ra>
